<compile_context>
chip_gen: v7x
topology: tpu7x:2x2x1
jax: 0.10.0
libtpu: 0.0.40
codegen_flags: <defaults>
</compile_context>

<pallas_src>
import numpy as np
import jax
import jax.numpy as jnp
from jax.experimental import pallas as pl
from jax.experimental.pallas import tpu as pltpu


# ------------------------------- kernel ------------------------------------ #

def _identity_kernel(x_ref, o_ref):
    # Plain elementwise copy of the current (TR, C) tile.
    o_ref[...] = x_ref[...]


# ------------------------------ planning ----------------------------------- #

def _plan_2d(n, last_dim, itemsize, target_block_bytes):
    """Pick a lane-dense (rows, cols) view and a row-tile size.

    cols is a multiple of 128 whenever n allows (unmasked full-width stores);
    otherwise we fall back to the array's own trailing dim.  The row tile is a
    multiple of 8 sublanes (or the full row extent), sized to ~target bytes.
    """
    cols = max(int(last_dim), 1)
    if n % 128 == 0:
        cols = 128
        for c in (2048, 1024, 512, 256):
            if n % c == 0:
                cols = c
                break
    rows = n // cols

    tr = max(1, target_block_bytes // (cols * itemsize))
    if tr < rows:
        tr = max(8, (tr // 8) * 8)
    if tr >= rows:
        tr = rows
    return rows, cols, tr


# ------------------------------ wrapper ------------------------------------ #

def pallas_identity(x, *, target_block_bytes=2 << 20):
    """Identity forward (y = x) implemented as a tiled Pallas copy kernel."""
    orig_shape = x.shape
    n = int(x.size)
    if n == 0:
        return x

    last_dim = orig_shape[-1] if x.ndim >= 1 else 1
    itemsize = np.dtype(x.dtype).itemsize
    rows, cols, tr = _plan_2d(n, last_dim, itemsize, target_block_bytes)

    x2 = x.reshape(rows, cols)          # contiguous reshape: layout plumbing only
    grid = (pl.cdiv(rows, tr),)

    out = pl.pallas_call(
        _identity_kernel,
        out_shape=jax.ShapeDtypeStruct((rows, cols), x.dtype),
        grid=grid,
        in_specs=[pl.BlockSpec((tr, cols), lambda i: (i, 0))],
        out_specs=pl.BlockSpec((tr, cols), lambda i: (i, 0)),
        input_output_aliases={0: 0},    # forward is identity / inplace-friendly
        compiler_params=pltpu.CompilerParams(
            dimension_semantics=("parallel",)),
    )(x2)
    return out.reshape(orig_shape)


# ------------------------------- module ------------------------------------ #

class SubModel:
    """JAX/Pallas port of the mmcls test-suite SubModel.

    The reference module builds conv1 / gn / fc / param1 but its forward
    ignores them and returns the input unchanged.  The parameters are kept as
    attributes only (never used in forward, matching the PyTorch module).
    """

    def __init__(self, key=None):
        key = jax.random.PRNGKey(0) if key is None else key
        k1, k2 = jax.random.split(key)
        # Unused-in-forward parameters, mirrored for structural fidelity.
        self.conv1_weight = jax.random.normal(k1, (2, 1, 1, 1), jnp.float32) * 0.5
        self.conv1_bias = jnp.zeros((2,), jnp.float32)
        self.gn_weight = jnp.ones((2,), jnp.float32)
        self.gn_bias = jnp.zeros((2,), jnp.float32)
        self.fc_weight = jax.random.normal(k2, (2, 2), jnp.float32) * 0.5
        self.fc_bias = jnp.zeros((2,), jnp.float32)
        self.param1 = jnp.ones((1,), jnp.float32)

    def __call__(self, x):
        return pallas_identity(x)


# -------------------------------- main -------------------------------------- #

if __name__ == "__main__":
    key = jax.random.PRNGKey(0)
    k1, k2, k3 = jax.random.split(key, 3)
    model = SubModel()

    # Shape consistent with the module (conv1 expects 2 channels): (B, C, H, W).
    x = jax.random.normal(k1, (2, 2, 16, 16), dtype=jnp.float32)
    x_np = np.asarray(x)                      # snapshot before the aliased call
    y = jax.block_until_ready(model(x))
    np.testing.assert_allclose(np.asarray(y), x_np, rtol=0, atol=0)

    # Exercise the multi-block (tiled, partial-last-block) path.
    x_med = jax.random.normal(k2, (23, 8, 128), dtype=jnp.float32)
    x_med_np = np.asarray(x_med)
    y_med = jax.block_until_ready(
        pallas_identity(x_med, target_block_bytes=64 * 1024))
    np.testing.assert_allclose(np.asarray(y_med), x_med_np, rtol=0, atol=0)

    # Exercise the non-lane-dense fallback (element count not a multiple of 128).
    x_odd = jax.random.normal(k3, (3, 5, 7), dtype=jnp.float32)
    x_odd_np = np.asarray(x_odd)
    y_odd = jax.block_until_ready(pallas_identity(x_odd))
    np.testing.assert_allclose(np.asarray(y_odd), x_odd_np, rtol=0, atol=0)

    print("KERNEL_OK")
</pallas_src>

<mosaic_0001>
module attributes {stable_mosaic.version = 11 : i64} {
  func.func @_identity_kernel(%arg0: i32, %arg1: memref<1x1024xf32, #tpu.memory_space<vmem>>, %arg2: memref<1x1024xf32, #tpu.memory_space<vmem>>) attributes {dimension_semantics = [#tpu.dimension_semantics<parallel>], iteration_bounds = array<i64: 1>, scalar_prefetch = 0 : i64, scratch_operands = 0 : i64, tpu.core_type = #tpu.core_type<tc>, window_params = [{transform_indices = @transform_0, window_bounds = array<i64: 1, 1024>}, {transform_indices = @transform_1, window_bounds = array<i64: 1, 1024>}]} {
    %c0 = arith.constant 0 : index
    %c0_0 = arith.constant 0 : index
    %0 = vector.load %arg1[%c0, %c0_0] : memref<1x1024xf32, #tpu.memory_space<vmem>>, vector<1x1024xf32>
    %c0_1 = arith.constant 0 : index
    %c0_2 = arith.constant 0 : index
    %1 = vector.load %arg2[%c0_1, %c0_2] : memref<1x1024xf32, #tpu.memory_space<vmem>>, vector<1x1024xf32>
    tpu.vector_store %arg2[%c0_1, %c0_2], %0 {strides = array<i32>} : memref<1x1024xf32, #tpu.memory_space<vmem>>, vector<1x1024xf32>,
    return
  }
  func.func @transform_0(%arg0: i32) -> (i32, i32) {
    %c0_i32 = arith.constant 0 : i32
    %c0_i32_0 = arith.constant 0 : i32
    return %arg0, %c0_i32 : i32, i32
  }
  func.func @transform_1(%arg0: i32) -> (i32, i32) {
    %c0_i32 = arith.constant 0 : i32
    %c0_i32_0 = arith.constant 0 : i32
    return %arg0, %c0_i32 : i32, i32
  }
}

</mosaic_0001>

<bundles_post_ra>
// kernel: tpu_custom_call.1
= control target key start
LH: loop header
LB: loop body
LE: loop exit
PB: predicated region body
PF: predicated region fallthrough
CT: control target
= control target key end

     0   :  { %6 = vsyncpa [#allocation3], 0  ;;  %s124_s0 = inlined_call_operand.hbm [shape: f32[1,1024], index: 0, kind: input, shape index: {}, may-alias: {0,1}]   ;;  %s125_s1 = inlined_call_operand.hbm [shape: f32[1,1024], index: 1, kind: output, shape index: {}, may-alias: {0,1}]  }
   0x1   :  { %7 = vsyncpa [#allocation4], 0  ;;  %s88_s6 = smov [#allocation2]   ;;  %s40_s10 = scalar_lea.hbm %s124_s0, 128 }
   0x2   :  { %s14_s7 = sshll.u32 %s88_s6, 4  ;;  %p41_p0 = scmp.ne.s32.totalorder %s124_s0, %s40_s10  ;;  %s15_s7 = int_to_ptr.vmem [resolvable:$true] %s14_s7 }
   0x3   :  { %p44_p1 = scmp.lt.u32.totalorder %s40_s10, %s124_s0 }
   0x5   :  { %p46_p2 = pnand %p44_p1, %p41_p0 }
   0x7   :  { %49 = shalt.err (!%p46_p2)
}
   0x8   :  { %s50_s15 = scalar_lea.vmem %s15_s7, 128  ;;  %p55_p4 = scmp.lt.s32.totalorder %s15_s7, %s15_s7 }
   0x9   :  { %p51_p3 = scmp.ne.s32.totalorder %s15_s7, %s50_s15  ;;  %p56_p5 = scmp.lt.s32.totalorder %s50_s15, %s50_s15 }
   0xb   :  { %p57_p6 = por %p56_p5, %p55_p4 }
   0xd   :  { %p58_p7 = pnand %p57_p6, %p51_p3 }
   0xf   :  { %61 = shalt.err (!%p58_p7)
}
  0x10   :  { %17 = dma.hbm_to_vmem [thread:$0]  %s124_s0, 128, %s15_s7, [#allocation3]  }
  0x11   :  { %84 = dma.done.wait [#allocation3], 128  }
  0x12   :  { %85 = vsyncadd [#allocation3], 4294967168  ;;  %s89_s18 = smov [#allocation5]   ;;  %v21_v0 = vld [vmem:[#allocation2] sm:$0xff] }
  0x13   :  { %s29_s19 = sshll.u32 %s89_s18, 4  ;;  %22 = vst [vmem:[#allocation5] sm:$0xff] %v21_v0  ;;  %s30_s19 = int_to_ptr.vmem [resolvable:$true] %s29_s19 }
  0x14   :  { %s62_s20 = scalar_lea.vmem %s30_s19, 128  ;;  %p67_p9 = scmp.lt.s32.totalorder %s30_s19, %s30_s19 }
  0x15   :  { %p63_p8 = scmp.ne.s32.totalorder %s30_s19, %s62_s20  ;;  %p68_p10 = scmp.lt.s32.totalorder %s62_s20, %s62_s20 }
  0x17   :  { %p69_p11 = por %p68_p10, %p67_p9 }
  0x19   :  { %p70_p12 = pnand %p69_p11, %p63_p8 }
  0x1b   :  { %73 = shalt.err (!%p70_p12)
}
  0x1c   :  { %s74_s23 = scalar_lea.hbm %s125_s1, 128 }
  0x1d   :  { %p75_p13 = scmp.ne.s32.totalorder %s125_s1, %s74_s23  ;;  %p78_p0 = scmp.lt.u32.totalorder %s74_s23, %s125_s1 }
  0x1f   :  { %p80_p1 = pnand %p78_p0, %p75_p13 }
  0x21   :  { %83 = shalt.err (!%p80_p1)
}
  0x22   :  { %32 = dma.vmem_to_hbm [thread:$0]  %s30_s19, 128, %s125_s1, [#allocation4]  }
  0x23   :  { %86 = dma.done.wait [#allocation4], 128  }
  0x24   :  { %87 = vsyncadd [#allocation4], 4294967168 }
  0x25   :  { %36 = vsyncpa [#allocation3], 1 }
  0x26   :  { %37 = vsyncpa [#allocation4], 1 }

</bundles_post_ra>
